<compile_context>
chip_gen: v5e
topology: v5e:2x2
jax: 0.10.0
libtpu: 0.0.40
codegen_flags: <defaults>
</compile_context>

<pallas_src>
import inspect
import math

import jax
import jax.numpy as jnp
from jax import lax
from jax.experimental import pallas as pl
from jax.experimental.pallas import tpu as pltpu

LN_EPS = 1e-5  # PyTorch nn.LayerNorm default


# ----------------------------- small utilities ------------------------------

def _round_up(n, m):
    return ((n + m - 1) // m) * m


def _cdiv(a, b):
    return -(-a // b)


def _vmem_capacity_bytes():
    """Physical per-core VMEM; conservative fallback if the query is unavailable."""
    try:
        info = pltpu.get_tpu_info()
        cap = getattr(info, "vmem_capacity_bytes", None)
        if cap:
            return int(cap)
    except Exception:  # hardware-query helper only; never masks kernel errors
        pass
    return 64 << 20  # v7x per-TensorCore VMEM (most restrictive generation)


def _vmem_limit(est_bytes, cap_bytes):
    return int(min(max(int(1.3 * est_bytes), 32 << 20), int(0.75 * cap_bytes)))


def _supports_pipeline_mode():
    if not hasattr(pl, "Buffered"):
        return False
    try:
        return "pipeline_mode" in inspect.signature(pl.BlockSpec).parameters
    except (TypeError, ValueError):
        return False


_HAS_PIPELINE_MODE = _supports_pipeline_mode()

_FALLBACK_ERRORS = (TypeError, ValueError, NotImplementedError, pltpu.LoweringException)
_jax_rt_err = getattr(getattr(jax, "errors", None), "JaxRuntimeError", None)
if isinstance(_jax_rt_err, type):
    _FALLBACK_ERRORS = _FALLBACK_ERRORS + (_jax_rt_err,)


def _pick_row_block(n_rows, target):
    """Row-block size (multiple of 8, preferring multiples of 128) and padded rows.

    Prefers a divisor of the (8-row-aligned) row count so no large pad/copy is
    needed, and caps the block so the row grid has >= 2 steps (v7x megacore)."""
    n8 = _round_up(max(n_rows, 1), 8)
    cap = target
    if n8 >= 16:
        cap = min(cap, _round_up(_cdiv(n8, 2), 8))
    cap = max(8, _round_up(min(cap, n8), 8))

    best = 0
    for step in (128, 8):  # prefer lane/MXU-friendly multiples of 128 first
        d = (cap // step) * step
        while d >= step:
            if n8 % d == 0:
                best = d
                break
            d -= step
        if best >= min(128, cap):
            break
    if best >= min(128, cap):
        return best, n8
    # No friendly divisor: pad up to a multiple of cap (pad < cap rows).
    return cap, _round_up(n8, cap)


def _pick_col_block(width, target):
    """Largest multiple-of-128 divisor of width that is <= target (or None)."""
    d = (min(target, width) // 128) * 128
    while d >= 128:
        if width % d == 0:
            return d
        d -= 128
    return None


# --------------------------------- kernels ----------------------------------

def _layer_norm(v, gamma, beta):
    m = jnp.mean(v, axis=-1, keepdims=True)
    d = v - m
    var = jnp.mean(d * d, axis=-1, keepdims=True)
    return d * lax.rsqrt(var + LN_EPS) * gamma + beta


def _fused_kernel(x_ref, w1t_ref, w2t_ref, gb_ref, o_ref):
    """Whole block: LN1 -> relu -> fc1 -> LN2 -> relu -> fc2 -> +x -> relu."""
    x = x_ref[...].astype(jnp.float32)
    gb = gb_ref[...]  # rows: g1, b1, g2, b2, padding

    a1 = jnp.maximum(_layer_norm(x, gb[0:1, :], gb[1:2, :]), 0.0)
    h = jnp.dot(a1.astype(jnp.bfloat16), w1t_ref[...],
                preferred_element_type=jnp.float32)
    # dropout(p=0.0) -> identity

    a2 = jnp.maximum(_layer_norm(h, gb[2:3, :], gb[3:4, :]), 0.0)
    out = jnp.dot(a2.astype(jnp.bfloat16), w2t_ref[...],
                  preferred_element_type=jnp.float32)

    # Residual add re-reads x from the VMEM input buffer (shorter live range).
    out = jnp.maximum(out + x_ref[...].astype(jnp.float32), 0.0)
    o_ref[...] = out.astype(o_ref.dtype)


def _stage1_kernel(x_ref, w1t_ref, gb_ref, h_ref, act_ref):
    """Weight-tiled path, stage 1: h[:, j] = relu(LN1(x)) @ W1^T[:, j]."""
    @pl.when(pl.program_id(1) == 0)
    def _():
        x = x_ref[...].astype(jnp.float32)
        gb = gb_ref[...]
        a = jnp.maximum(_layer_norm(x, gb[0:1, :], gb[1:2, :]), 0.0)
        act_ref[...] = a.astype(jnp.bfloat16)

    h_ref[...] = jnp.dot(act_ref[...], w1t_ref[...],
                         preferred_element_type=jnp.float32)


def _stage2_kernel(h_ref, x_ref, w2t_ref, gb_ref, o_ref, act_ref):
    """Weight-tiled path, stage 2: out[:, j] = relu(relu(LN2(h)) @ W2^T[:, j] + x[:, j])."""
    @pl.when(pl.program_id(1) == 0)
    def _():
        h = h_ref[...]
        gb = gb_ref[...]
        a = jnp.maximum(_layer_norm(h, gb[2:3, :], gb[3:4, :]), 0.0)
        act_ref[...] = a.astype(jnp.bfloat16)

    out = jnp.dot(act_ref[...], w2t_ref[...], preferred_element_type=jnp.float32)
    out = jnp.maximum(out + x_ref[...].astype(jnp.float32), 0.0)
    o_ref[...] = out.astype(o_ref.dtype)


# -------------------------------- wrappers -----------------------------------

def prepare_residual_layer_params(w1, g1, b1, w2, g2, b2):
    """One-time parameter prep (hoisted out of the forward call).

    w1/w2 use the PyTorch nn.Linear (out_features, in_features) convention."""
    width = w1.shape[0]
    w1t = w1.T.astype(jnp.bfloat16)   # (in, out), MXU-native bf16
    w2t = w2.T.astype(jnp.bfloat16)
    gb = jnp.stack([g1, b1, g2, b2], axis=0).astype(jnp.float32)
    gb = jnp.pad(gb, ((0, 4), (0, 0)))  # pad to (8, width): one sublane tile
    assert gb.shape == (8, width)
    return w1t, w2t, gb


def _fused_forward(x_p, w1t, w2t, gb, br, vmem_limit, out_dtype):
    n_pad, width = x_p.shape
    grid = (n_pad // br,)
    const = lambda i: (0, 0)

    def build(single_buffer_consts):
        kw = dict(pipeline_mode=pl.Buffered(1)) if single_buffer_consts else {}
        return pl.pallas_call(
            _fused_kernel,
            out_shape=jax.ShapeDtypeStruct((n_pad, width), out_dtype),
            grid_spec=pltpu.PrefetchScalarGridSpec(
                num_scalar_prefetch=0,
                grid=grid,
                in_specs=[
                    pl.BlockSpec((br, width), lambda i: (i, 0)),      # x rows
                    pl.BlockSpec((width, width), const, **kw),        # W1^T (bf16)
                    pl.BlockSpec((width, width), const, **kw),        # W2^T (bf16)
                    pl.BlockSpec((8, width), const, **kw),            # packed LN params
                ],
                out_specs=pl.BlockSpec((br, width), lambda i: (i, 0)),
            ),
            compiler_params=pltpu.CompilerParams(
                dimension_semantics=("parallel",),      # row blocks shard across TCs
                vmem_limit_bytes=vmem_limit,
            ),
        )

    if _HAS_PIPELINE_MODE:
        try:
            return build(True)(x_p, w1t, w2t, gb)
        except _FALLBACK_ERRORS:
            # pipeline_mode=Buffered(1) not supported in this build; genuine
            # kernel errors will re-surface from the double-buffered call below.
            pass
    return build(False)(x_p, w1t, w2t, gb)


def _tiled_forward(x_p, w1t, w2t, gb, br, tn, vmem_limit, out_dtype):
    n_pad, width = x_p.shape
    grid = (n_pad // br, width // tn)
    cp = pltpu.CompilerParams(
        dimension_semantics=("parallel", "arbitrary"),
        vmem_limit_bytes=vmem_limit,
    )

    h = pl.pallas_call(
        _stage1_kernel,
        out_shape=jax.ShapeDtypeStruct((n_pad, width), jnp.float32),
        grid_spec=pltpu.PrefetchScalarGridSpec(
            num_scalar_prefetch=0,
            grid=grid,
            in_specs=[
                pl.BlockSpec((br, width), lambda i, j: (i, 0)),   # x rows (resident over j)
                pl.BlockSpec((width, tn), lambda i, j: (0, j)),   # W1^T column tile
                pl.BlockSpec((8, width), lambda i, j: (0, 0)),    # LN params
            ],
            out_specs=pl.BlockSpec((br, tn), lambda i, j: (i, j)),
            scratch_shapes=[pltpu.VMEM((br, width), jnp.bfloat16)],
        ),
        compiler_params=cp,
    )(x_p, w1t, gb)

    out = pl.pallas_call(
        _stage2_kernel,
        out_shape=jax.ShapeDtypeStruct((n_pad, width), out_dtype),
        grid_spec=pltpu.PrefetchScalarGridSpec(
            num_scalar_prefetch=0,
            grid=grid,
            in_specs=[
                pl.BlockSpec((br, width), lambda i, j: (i, 0)),   # h rows
                pl.BlockSpec((br, tn), lambda i, j: (i, j)),      # x residual slice
                pl.BlockSpec((width, tn), lambda i, j: (0, j)),   # W2^T column tile
                pl.BlockSpec((8, width), lambda i, j: (0, 0)),    # LN params
            ],
            out_specs=pl.BlockSpec((br, tn), lambda i, j: (i, j)),
            scratch_shapes=[pltpu.VMEM((br, width), jnp.bfloat16)],
        ),
        compiler_params=cp,
    )(h, x_p, w2t, gb)
    return out


def residual_layer_apply(x, params, *, block_rows=512, weight_tile=512,
                         force_weight_tiling=False):
    """Apply the ResidualLayer to x of shape (..., width). x may be f32 or bf16."""
    w1t, w2t, gb = params
    orig_shape = x.shape
    width = orig_shape[-1]
    assert w1t.shape == (width, width) and w2t.shape == (width, width)

    x2d = x.reshape(-1, width)
    n = x2d.shape[0]
    br, n_pad = _pick_row_block(n, block_rows)
    x_p = x2d if n_pad == n else jnp.pad(x2d, ((0, n_pad - n), (0, 0)))

    cap = _vmem_capacity_bytes()
    xb = jnp.dtype(x.dtype).itemsize
    wbuf = 1 if _HAS_PIPELINE_MODE else 2

    def resident_est(weight_bufs):
        return (2 * 2 * br * width * xb                  # x + out blocks, double-buffered
                + 2 * weight_bufs * width * width * 2    # both bf16 weights
                + weight_bufs * 8 * width * 4            # LN params
                + 6 * br * width * 4)                    # f32 intermediates / headroom

    tn = None
    if force_weight_tiling or resident_est(wbuf) > int(0.7 * cap):
        tn = _pick_col_block(width, weight_tile)

    if tn is None:
        # Fused, weight-resident path (limit sized for worst-case double buffering).
        out = _fused_forward(x_p, w1t, w2t, gb, br,
                             _vmem_limit(resident_est(2), cap), x.dtype)
    else:
        tiled_est = (2 * br * width * 4          # h block (stage 2 input)
                     + 2 * br * width * xb       # x block (stage 1 input)
                     + 2 * width * tn * 2        # weight column tile, double-buffered
                     + 2 * 8 * width * 4         # LN params
                     + 2 * br * tn * 4           # output tile
                     + br * width * 2            # bf16 activation scratch
                     + 4 * br * width * 4)       # f32 LN intermediates / headroom
        out = _tiled_forward(x_p, w1t, w2t, gb, br, tn,
                             _vmem_limit(tiled_est, cap), x.dtype)

    if n_pad != n:
        out = out[:n]
    return out.reshape(orig_shape)


def residual_layer(x, w1, g1, b1, w2, g2, b2, **kwargs):
    """Convenience one-shot API; prefer prepare_...() + ..._apply() in a model."""
    return residual_layer_apply(x, prepare_residual_layer_params(w1, g1, b1, w2, g2, b2),
                                **kwargs)


# ------------------------------ reference & test ------------------------------

def weight_initializer(key, shape):
    """Matches Linear.reset_parameters: trunc_normal(0, std) clipped to ±2*std,
    std = sqrt(1 / fan_avg / 10), fan_avg = 0.5*(in + out)."""
    fan_avg = 0.5 * (shape[-1] + shape[-2])
    std = math.sqrt(1.0 / fan_avg / 10.0)
    return std * jax.random.truncated_normal(key, -2.0, 2.0, shape, jnp.float32)


def reference(x, w1, g1, b1, w2, g2, b2):
    def ln(v, g, b):
        m = jnp.mean(v, axis=-1, keepdims=True)
        var = jnp.mean((v - m) ** 2, axis=-1, keepdims=True)
        return (v - m) / jnp.sqrt(var + LN_EPS) * g + b

    h = jnp.maximum(ln(x, g1, b1), 0.0) @ w1.T
    h2 = jnp.maximum(ln(h, g2, b2), 0.0) @ w2.T
    return jnp.maximum(h2 + x, 0.0)


if __name__ == "__main__":
    key = jax.random.PRNGKey(0)

    def make_case(case_key, n, width):
        kx, kw1, kw2, kg = jax.random.split(case_key, 4)
        x = jax.random.normal(kx, (n, width), jnp.float32)
        w1 = weight_initializer(kw1, (width, width))   # PyTorch (out, in) layout
        w2 = weight_initializer(kw2, (width, width))
        kg1, kg2, kb1, kb2 = jax.random.split(kg, 4)
        g1 = 1.0 + 0.1 * jax.random.normal(kg1, (width,), jnp.float32)
        g2 = 1.0 + 0.1 * jax.random.normal(kg2, (width,), jnp.float32)
        b1 = 0.1 * jax.random.normal(kb1, (width,), jnp.float32)
        b2 = 0.1 * jax.random.normal(kb2, (width,), jnp.float32)
        return x, (w1, g1, b1, w2, g2, b2)

    k1, k2 = jax.random.split(key)

    # Case 1: small shape -> fused weight-resident path (row grid has 2 steps).
    x, raw = make_case(k1, 16, 128)
    params = prepare_residual_layer_params(*raw)       # hoisted one-time prep
    out = jax.block_until_ready(residual_layer_apply(x, params))
    ref = reference(x, *raw)
    assert out.shape == ref.shape
    # bf16 matmul operands (f32 accumulate) -> slightly looser tolerance than pure-f32.
    assert jnp.allclose(out, ref, atol=2e-2, rtol=2e-2), "fused path mismatch vs reference"

    # Case 2: exercise the weight-tiled (large-width / small-VMEM) path at small scale.
    x2, raw2 = make_case(k2, 64, 256)
    params2 = prepare_residual_layer_params(*raw2)
    out2 = jax.block_until_ready(
        residual_layer_apply(x2, params2, weight_tile=128, force_weight_tiling=True))
    ref2 = reference(x2, *raw2)
    assert jnp.allclose(out2, ref2, atol=2e-2, rtol=2e-2), "tiled path mismatch vs reference"

    print("KERNEL_OK")
</pallas_src>

<mosaic_0001>
module attributes {stable_mosaic.version = 11 : i64} {
  func.func @_fused_kernel(%arg0: i32, %arg1: memref<8x128xf32, #tpu.memory_space<vmem>>, %arg2: memref<128x128xbf16, #tpu.memory_space<vmem>>, %arg3: memref<128x128xbf16, #tpu.memory_space<vmem>>, %arg4: memref<8x128xf32, #tpu.memory_space<vmem>>, %arg5: memref<8x128xf32, #tpu.memory_space<vmem>>) attributes {dimension_semantics = [#tpu.dimension_semantics<parallel>], iteration_bounds = array<i64: 2>, scalar_prefetch = 0 : i64, scratch_operands = 0 : i64, tpu.core_type = #tpu.core_type<tc>, window_params = [{transform_indices = @transform_0, window_bounds = array<i64: 8, 128>}, {pipeline_mode = #tpu.pipeline_mode<synchronous>, transform_indices = @transform_1, window_bounds = array<i64: 128, 128>}, {pipeline_mode = #tpu.pipeline_mode<synchronous>, transform_indices = @transform_2, window_bounds = array<i64: 128, 128>}, {pipeline_mode = #tpu.pipeline_mode<synchronous>, transform_indices = @transform_3, window_bounds = array<i64: 8, 128>}, {transform_indices = @transform_4, window_bounds = array<i64: 8, 128>}]} {
    %c0 = arith.constant 0 : index
    %c0_0 = arith.constant 0 : index
    %0 = vector.load %arg1[%c0, %c0_0] : memref<8x128xf32, #tpu.memory_space<vmem>>, vector<8x128xf32>
    %c0_1 = arith.constant 0 : index
    %c0_2 = arith.constant 0 : index
    %1 = vector.load %arg4[%c0_1, %c0_2] : memref<8x128xf32, #tpu.memory_space<vmem>>, vector<8x128xf32>
    %2 = vector.extract_strided_slice %1 {offsets = [0, 0], sizes = [1, 128], strides = [1, 1]} : vector<8x128xf32> to vector<1x128xf32>
    %3 = vector.extract_strided_slice %1 {offsets = [1, 0], sizes = [1, 128], strides = [1, 1]} : vector<8x128xf32> to vector<1x128xf32>
    %cst = arith.constant dense<0.000000e+00> : vector<8xf32>
    %4 = vector.multi_reduction <add>, %0, %cst [1] : vector<8x128xf32> to vector<8xf32>
    %5 = vector.shape_cast %4 : vector<8xf32> to vector<8x1xf32>
    %cst_3 = arith.constant 1.280000e+02 : f32
    %6 = vector.broadcast %cst_3 : f32 to vector<8x1xf32>
    %7 = arith.divf %5, %6 : vector<8x1xf32>
    %8 = vector.broadcast %7 : vector<8x1xf32> to vector<8x128xf32>
    %9 = arith.subf %0, %8 : vector<8x128xf32>
    %10 = arith.mulf %9, %9 : vector<8x128xf32>
    %cst_4 = arith.constant dense<0.000000e+00> : vector<8xf32>
    %11 = vector.multi_reduction <add>, %10, %cst_4 [1] : vector<8x128xf32> to vector<8xf32>
    %12 = vector.shape_cast %11 : vector<8xf32> to vector<8x1xf32>
    %cst_5 = arith.constant 1.280000e+02 : f32
    %13 = vector.broadcast %cst_5 : f32 to vector<8x1xf32>
    %14 = arith.divf %12, %13 : vector<8x1xf32>
    %cst_6 = arith.constant 9.99999974E-6 : f32
    %15 = vector.broadcast %cst_6 : f32 to vector<8x1xf32>
    %16 = arith.addf %14, %15 : vector<8x1xf32>
    %17 = math.rsqrt %16 : vector<8x1xf32>
    %18 = vector.broadcast %17 : vector<8x1xf32> to vector<8x128xf32>
    %19 = arith.mulf %9, %18 : vector<8x128xf32>
    %20 = vector.broadcast %2 : vector<1x128xf32> to vector<8x128xf32>
    %21 = arith.mulf %19, %20 : vector<8x128xf32>
    %22 = vector.broadcast %3 : vector<1x128xf32> to vector<8x128xf32>
    %23 = arith.addf %21, %22 : vector<8x128xf32>
    %cst_7 = arith.constant 0.000000e+00 : f32
    %24 = vector.broadcast %cst_7 : f32 to vector<8x128xf32>
    %25 = arith.maximumf %23, %24 : vector<8x128xf32>
    %26 = arith.truncf %25 : vector<8x128xf32> to vector<8x128xbf16>
    %c0_8 = arith.constant 0 : index
    %c0_9 = arith.constant 0 : index
    %27 = vector.load %arg2[%c0_8, %c0_9] : memref<128x128xbf16, #tpu.memory_space<vmem>>, vector<128x128xbf16>
    %cst_10 = arith.constant dense<0.000000e+00> : vector<8x128xf32>
    %28 = tpu.matmul %26, %27, %cst_10 {dimension_numbers = #tpu.dot_dimension_numbers<[1], [0], [0], [1], [0, 0, 1, 1], [], []>} : vector<8x128xbf16>, vector<128x128xbf16>, vector<8x128xf32> -> vector<8x128xf32>
    %29 = vector.extract_strided_slice %1 {offsets = [2, 0], sizes = [1, 128], strides = [1, 1]} : vector<8x128xf32> to vector<1x128xf32>
    %30 = vector.extract_strided_slice %1 {offsets = [3, 0], sizes = [1, 128], strides = [1, 1]} : vector<8x128xf32> to vector<1x128xf32>
    %cst_11 = arith.constant dense<0.000000e+00> : vector<8xf32>
    %31 = vector.multi_reduction <add>, %28, %cst_11 [1] : vector<8x128xf32> to vector<8xf32>
    %32 = vector.shape_cast %31 : vector<8xf32> to vector<8x1xf32>
    %cst_12 = arith.constant 1.280000e+02 : f32
    %33 = vector.broadcast %cst_12 : f32 to vector<8x1xf32>
    %34 = arith.divf %32, %33 : vector<8x1xf32>
    %35 = vector.broadcast %34 : vector<8x1xf32> to vector<8x128xf32>
    %36 = arith.subf %28, %35 : vector<8x128xf32>
    %37 = arith.mulf %36, %36 : vector<8x128xf32>
    %cst_13 = arith.constant dense<0.000000e+00> : vector<8xf32>
    %38 = vector.multi_reduction <add>, %37, %cst_13 [1] : vector<8x128xf32> to vector<8xf32>
    %39 = vector.shape_cast %38 : vector<8xf32> to vector<8x1xf32>
    %cst_14 = arith.constant 1.280000e+02 : f32
    %40 = vector.broadcast %cst_14 : f32 to vector<8x1xf32>
    %41 = arith.divf %39, %40 : vector<8x1xf32>
    %cst_15 = arith.constant 9.99999974E-6 : f32
    %42 = vector.broadcast %cst_15 : f32 to vector<8x1xf32>
    %43 = arith.addf %41, %42 : vector<8x1xf32>
    %44 = math.rsqrt %43 : vector<8x1xf32>
    %45 = vector.broadcast %44 : vector<8x1xf32> to vector<8x128xf32>
    %46 = arith.mulf %36, %45 : vector<8x128xf32>
    %47 = vector.broadcast %29 : vector<1x128xf32> to vector<8x128xf32>
    %48 = arith.mulf %46, %47 : vector<8x128xf32>
    %49 = vector.broadcast %30 : vector<1x128xf32> to vector<8x128xf32>
    %50 = arith.addf %48, %49 : vector<8x128xf32>
    %cst_16 = arith.constant 0.000000e+00 : f32
    %51 = vector.broadcast %cst_16 : f32 to vector<8x128xf32>
    %52 = arith.maximumf %50, %51 : vector<8x128xf32>
    %53 = arith.truncf %52 : vector<8x128xf32> to vector<8x128xbf16>
    %c0_17 = arith.constant 0 : index
    %c0_18 = arith.constant 0 : index
    %54 = vector.load %arg3[%c0_17, %c0_18] : memref<128x128xbf16, #tpu.memory_space<vmem>>, vector<128x128xbf16>
    %cst_19 = arith.constant dense<0.000000e+00> : vector<8x128xf32>
    %55 = tpu.matmul %53, %54, %cst_19 {dimension_numbers = #tpu.dot_dimension_numbers<[1], [0], [0], [1], [0, 0, 1, 1], [], []>} : vector<8x128xbf16>, vector<128x128xbf16>, vector<8x128xf32> -> vector<8x128xf32>
    %c0_20 = arith.constant 0 : index
    %c0_21 = arith.constant 0 : index
    %56 = vector.load %arg1[%c0_20, %c0_21] : memref<8x128xf32, #tpu.memory_space<vmem>>, vector<8x128xf32>
    %57 = arith.addf %55, %56 : vector<8x128xf32>
    %cst_22 = arith.constant 0.000000e+00 : f32
    %58 = vector.broadcast %cst_22 : f32 to vector<8x128xf32>
    %59 = arith.maximumf %57, %58 : vector<8x128xf32>
    %c0_23 = arith.constant 0 : index
    %c0_24 = arith.constant 0 : index
    %60 = vector.load %arg5[%c0_23, %c0_24] : memref<8x128xf32, #tpu.memory_space<vmem>>, vector<8x128xf32>
    tpu.vector_store %arg5[%c0_23, %c0_24], %59 {strides = array<i32>} : memref<8x128xf32, #tpu.memory_space<vmem>>, vector<8x128xf32>,
    return
  }
  func.func @transform_0(%arg0: i32) -> (i32, i32) {
    %c0_i32 = arith.constant 0 : i32
    %c0_i32_0 = arith.constant 0 : i32
    return %arg0, %c0_i32 : i32, i32
  }
  func.func @transform_1(%arg0: i32) -> (i32, i32) {
    %c0_i32 = arith.constant 0 : i32
    %c0_i32_0 = arith.constant 0 : i32
    %c0_i32_1 = arith.constant 0 : i32
    return %c0_i32, %c0_i32_0 : i32, i32
  }
  func.func @transform_2(%arg0: i32) -> (i32, i32) {
    %c0_i32 = arith.constant 0 : i32
    %c0_i32_0 = arith.constant 0 : i32
    %c0_i32_1 = arith.constant 0 : i32
    return %c0_i32, %c0_i32_0 : i32, i32
  }
  func.func @transform_3(%arg0: i32) -> (i32, i32) {
    %c0_i32 = arith.constant 0 : i32
    %c0_i32_0 = arith.constant 0 : i32
    %c0_i32_1 = arith.constant 0 : i32
    return %c0_i32, %c0_i32_0 : i32, i32
  }
  func.func @transform_4(%arg0: i32) -> (i32, i32) {
    %c0_i32 = arith.constant 0 : i32
    %c0_i32_0 = arith.constant 0 : i32
    return %arg0, %c0_i32 : i32, i32
  }
}

</mosaic_0001>

<bundles_post_ra>
// kernel: tpu_custom_call.1
= control target key start
LH: loop header
LB: loop body
LE: loop exit
PB: predicated region body
PF: predicated region fallthrough
CT: control target
= control target key end

     0   :  { %9 = vsyncpa [#allocation3], 0  ;;  %s1177_s0 = inlined_call_operand.hbm [shape: f32[16,128], index: 0, kind: input, shape index: {}]   ;;  %s1178_s1 = inlined_call_operand.hbm [shape: bf16[128,128], index: 1, kind: input, shape index: {}]   ;;  %s1179_s2 = inlined_call_operand.hbm [shape: bf16[128,128], index: 2, kind: input, shape index: {}]   ;;  %s1180_s3 = inlined_call_operand.hbm [shape: f32[8,128], index: 3, kind: input, shape index: {}]   ;;  %s1181_s4 = inlined_call_operand.hbm [shape: f32[16,128], index: 4, kind: output, shape index: {}]  }
   0x1   :  { %11 = vsyncpa [#allocation3 + $0x1], 0 }
   0x2   :  { %12 = vsyncpa [#allocation6], 0 }
   0x3   :  { %13 = vsyncpa [#allocation9], 0 }
   0x4   :  { %14 = vsyncpa [#allocation4], 0 }
   0x5   :  { %16 = vsyncpa [#allocation4 + $0x1], 0  ;;  %s1006_s15 = smov 0   ;;  %s1008_s16 = smov 0  }
   0x6   :  { %s1010_s17 = smov 0   ;;  %s1012_s18 = smov 0  }
   0x7 LB: > { %s153_s21 = sshll.u32 %s1178_s1, 4  ;;  %s1030_s22 = sadd.s32 4294967295, %s973_s18   ;;  %s973_s18 = sphi %s1012_s18, %s1192_s18   ;;  %s969_s17 = sphi %s1010_s17, %s1191_s17   ;;  %s965_s16 = sphi %s1008_s16, %s1190_s16   ;;  %s961_s15 = sphi %s1006_s15, %s1189_s15   ;;  %s154_s21 = int_to_ptr.hbm [resolvable:$true] %s153_s21 }
   0x8   : > { %p596_p0 = scmp.ge.s32.totalorder %s973_s18, 1  ;;  %p43_p1 = scmp.eq.s32.totalorder %s1030_s22, 0 }
   0x9   : > { %p142_p2 = scmp.lt.s32.totalorder %s973_s18, 3  ;;  %s975_s24 = smov [#allocation5]  }
   0xa   : > { %s155_s25 = sshll.u32 %s975_s24, 4  ;;  %s167_s28 = sshll.u32 %s1179_s2, 4  ;;  %s156_s25 = int_to_ptr.vmem [resolvable:$true] %s155_s25  ;;  %s168_s28 = int_to_ptr.hbm [resolvable:$true] %s167_s28 }
   0xb   : > { %p1035_p3 = pnand %p596_p0, %p142_p2  ;;  %s182_s6 = sshll.u32 %s1180_s3, 4  ;;  %s183_s6 = int_to_ptr.hbm [resolvable:$true] %s182_s6 }
   0xc   : > { %s976_s7 = smov [#allocation7]   ;;  %s977_s9 = smov 64  }
   0xd   : > { %p709_p4 = pneg %p1035_p3  ;;  %s169_s8 = sshll.u32 %s976_s7, 4  ;;  %s170_s8 = int_to_ptr.vmem [resolvable:$true] %s169_s8 }
   0xe   : > { %s978_s10 = smov 4   ;;  %s979_s11 = smov [#allocation8]  }
   0xf   : > { %p1047_p6 = pnand %p709_p4, %p43_p1  ;;  %s184_s12 = sshll.u32 %s979_s11, 4  ;;  %s185_s12 = int_to_ptr.vmem [resolvable:$true] %s184_s12 }
  0x10   : > { %s595_s13 = sadd.s32 4294967294, %s973_s18   ;;  %s1062_s14 = sadd.s32 1, %s973_s18  }
  0x11   : > { %712 = dma.hbm_to_vmem [thread:$0]  (!%p1047_p6), %s154_s21, 1024, %s156_s25, [#allocation6], %s977_s9, %s977_s9, %s978_s10  }
  0x12   : > { %715 = dma.hbm_to_vmem [thread:$0]  (!%p1047_p6), %s168_s28, 1024, %s170_s8, [#allocation6], %s977_s9, %s977_s9, %s978_s10  }
  0x13   : > { %718 = dma.hbm_to_vmem [thread:$0]  (!%p1047_p6), %s183_s6, 128, %s185_s12, [#allocation9]  }
  0x14   : > { %s29_s19 = sadd.s32 1, %s969_s17  ;;  %s26_s20 = ssub.s32 %s973_s18, %s1062_s14 }
  0x15   : > { %p36_p7 = scmp.ne.s32.totalorder %s969_s17, %s965_s16  ;;  %p27_p8 = scmp.eq.s32.totalorder %s26_s20, 0 }
  0x16   : > { %p37_p9 = scmp.eq.s32.totalorder %s973_s18, 0  ;;  %p42_p10 = scmp.ne.s32.totalorder %s965_s16, %s961_s15 }
  0x17   : > { %p129_p11 = scmp.eq.s32.totalorder %s1030_s22, 1  ;;  %p135_p0 = scmp.eq.s32.totalorder %s595_s13, 1 }
  0x18   : > { %s1074_s21 = scalar_select %p27_p8, %s969_s17, %s29_s19  }
  0x19   : > { %p1078_p12 = por %p43_p1, %p42_p10  ;;  %p1082_p13 = por %p129_p11, %p36_p7 }
  0x1a   : > { %p38_p2 = por %p37_p9, %p36_p7  ;;  %s195_s26 = sand.u32 1, %s969_s17  }
  0x1b   : > { %p1087_p4 = por %p135_p0, %p42_p10  ;;  %p730_p6 = scmp.lt.s32.totalorder %s973_s18, 2 }
  0x1c   : > { %s601_s28 = sshll.u32 %s195_s26, 3  ;;  %s602_s29 = sshll.u32 %s973_s18, 3 }
  0x1d   : > { %s203_s6 = scalar_lea.hbm %s1177_s0, %s602_s29  ;;  %s199_s8 = scalar_lea.vmem [#allocation2], %s601_s28 }
  0x1e   : > { %s205_s7 = sshll.u32 %s203_s6, 4  ;;  %s207_s9 = sshll.u32 %s199_s8, 4  ;;  %s206_s7 = int_to_ptr.hbm [resolvable:$true] %s205_s7  ;;  %s208_s9 = int_to_ptr.vmem [resolvable:$true] %s207_s9 }
  0x1f   : > { %p1096_p8 = pnand %p730_p6, %p38_p2  ;;  %s196_s11 = scalar_lea.sflag [#allocation3], %s195_s26 }
  0x20   : > { %s869_s12 = sshra.s32 %s206_s7, 4  ;;  %s876_s28 = scalar_lea.hbm %s1177_s0, 16  ;;  %s870_s12 = int_to_ptr.hbm [resolvable:$true] %s869_s12 }
  0x21   : > { %s871_s13 = scalar_lea.hbm %s870_s12, 8  ;;  %p873_p9 = pneg %p1096_p8 }
  0x22   : > { %p872_p7 = scmp.ne.s32.totalorder %s870_s12, %s871_s13  ;;  %p877_p0 = scmp.lt.s32.totalorder %s870_s12, %s1177_s0 }
  0x23   : > { %p878_p2 = scmp.lt.s32.totalorder %s876_s28, %s871_s13 }
  0x24   : > { %p874_p10 = pnand %p873_p9, %p872_p7 }
  0x25   : > { %p879_p6 = por %p878_p2, %p877_p0 }
  0x26   : > { %p875_p11 = pneg %p874_p10 }
  0x28   : > { %p880_p5 = pnand %p879_p6, %p875_p11 }
  0x2a   : > { %883 = shalt.err (!%p880_p5)
}
  0x2b   : > { %722 = dma.hbm_to_vmem [thread:$0]  (!%p1096_p8), %s206_s7, 128, %s208_s9, %s196_s11  }
  0x2c   : > { %216 = sbr.rel (%p1035_p3) target bundleno = 855 (0x357), region = 36  ;;  %s1113_s26 = sand.u32 (!%p1035_p3), 1, %s965_s16  }
  0x2d   : > { %s604_s5 = sshll.u32 (!%p1035_p3), %s1113_s26, 3  ;;  %s219_s6 = scalar_lea.sflag (!%p1035_p3), [#allocation3], %s1113_s26 }
  0x2e   : > { %s222_s8 = scalar_lea.vmem (!%p1035_p3), [#allocation2], %s604_s5 }
  0x31   : > { %944 = dma.done.wait (%p1078_p12), %s219_s6, 128  }
  0x32   : > { %946 = vsyncadd (%p1078_p12), %s219_s6, 4294967168 }
  0x33   : > { %948 = dma.done.wait (%p43_p1), [#allocation6], 2048  }
  0x34   : > { %950 = vsyncadd (%p43_p1), [#allocation6], 4294965248 }
  0x35   : > { %952 = dma.done.wait (%p43_p1), [#allocation9], 128  }
  0x36   : > { %954 = vsyncadd (%p43_p1), [#allocation9], 4294967168  ;;  %v1131_v0 = vld [vmem:[%s222_s8] sm:$0xff]  ;;  %v980_v1 = vmov 128.0   ;;  %v682_v14 = vld [vmem:[#allocation5 + $0x28] sm:$0xff]  ;;  %s674_s23 = sshll.u32 %s1030_s22, 3 }
  0x37   : > { %265 = vadd.xlane.f32.xlu0 %v1131_v0  ;;  %773 = vrcp.f32 %v980_v1  ;;  %v684_v12 = vld [vmem:[#allocation5 + $0x38] sm:$0xff]  ;;  %v683_v13 = vld [vmem:[#allocation5 + $0x30] sm:$0xff]  ;;  %v681_v15 = vld [vmem:[#allocation5 + $0x20] sm:$0xff]  ;;  %s491_s9 = scalar_lea.hbm %s1181_s4, %s674_s23  ;;  %s262_s10 = scalar_lea.vmem [#allocation10], %s604_s5 }
  0x38   : > { %362 = vmatpush.bf16.msra.mxu0 %v684_v12  ;;  %v680_v16 = vld [vmem:[#allocation5 + $0x18] sm:$0xff]  ;;  %v679_v17 = vld [vmem:[#allocation5 + $0x10] sm:$0xff]  ;;  %v678_v18 = vld [vmem:[#allocation5 + $0x8] sm:$0xff]  ;;  %s493_s11 = sshll.u32 %s262_s10, 4  ;;  %s495_s12 = sshll.u32 %s491_s9, 4  ;;  %s494_s11 = int_to_ptr.vmem [resolvable:$true] %s493_s11  ;;  %s496_s12 = int_to_ptr.hbm [resolvable:$true] %s495_s12 }
  0x39   : > { %v677_v19 = vld [vmem:[#allocation5] sm:$0xff]  ;;  %v692_v44 = vld [vmem:[#allocation7 + $0x38] sm:$0xff]  ;;  %v691_v45 = vld [vmem:[#allocation7 + $0x30] sm:$0xff]  ;;  %s481_s13 = scalar_lea.sflag [#allocation4], %s1113_s26  ;;  %s913_s19 = sshra.s32 %s496_s12, 4  ;;  %s914_s19 = int_to_ptr.hbm [resolvable:$true] %s913_s19 }
  0x3a   : > { %v264_v28 = vld [vmem:[#allocation8] sm:$0xff]  ;;  %465 = vmatpush.bf16.msra.mxu1 %v692_v44  ;;  %v690_v46 = vld [vmem:[#allocation7 + $0x28] sm:$0xff]  ;;  %v688_v48 = vld [vmem:[#allocation7 + $0x18] sm:$0xff]  ;;  %s915_s22 = scalar_lea.hbm %s914_s19, 8  ;;  %s919_s29 = scalar_lea.hbm %s1181_s4, 16 }
  0x3b   : > { %v292_v30 = vperm.slane %v264_v28, 0  ;;  %v294_v33 = vperm.slane %v264_v28, 1  ;;  %v689_v47 = vld [vmem:[#allocation7 + $0x20] sm:$0xff]  ;;  %v687_v49 = vld [vmem:[#allocation7 + $0x10] sm:$0xff]  ;;  %v686_v50 = vld [vmem:[#allocation7 + $0x8] sm:$0xff]  ;;  %v395_v61 = vperm.slane %v264_v28, 2  ;;  %p916_p1 = scmp.ne.s32.totalorder %s914_s19, %s915_s22  ;;  %p920_p12 = scmp.lt.s32.totalorder %s914_s19, %s1181_s4 }
  0x3c   : > { %363 = vmatpush.bf16.msra.mxu0 %v683_v13  ;;  %v685_v51 = vld [vmem:[#allocation7] sm:$0xff]  ;;  %v397_v1 = vperm.slane %v264_v28, 3  ;;  %p921_p8 = scmp.lt.s32.totalorder %s919_s29, %s915_s22 }
  0x3d   : > { %v774_v2 = vpop.eup %773  ;;  %p917_p3 = pnand %p916_p1, %p1082_p13 }
  0x3e   : > { %v268_v3 = vmul.f32 128.0, %v774_v2  ;;  %vm272_vm0 = vweird.f32 %v774_v2  ;;  %466 = vmatpush.bf16.msra.mxu1 %v691_v45  ;;  %p922_p7 = por %p921_p8, %p920_p12 }
  0x3f   : > { %p918_p5 = pneg %p917_p3 }
  0x40   : > { %v269_v4 = vsub.f32 1.0, %v268_v3  ;;  %364 = vmatpush.bf16.msra.mxu0 %v682_v14 }
  0x41   : > { %p923_p9 = pnand %p922_p7, %p918_p5 }
  0x42   : > { %v270_v5 = vmul.f32 %v774_v2, %v269_v4  ;;  %467 = vmatpush.bf16.msra.mxu1 %v690_v46 }
  0x44   : > { %v271_v6 = vadd.f32 %v774_v2, %v270_v5  ;;  %365 = vmatpush.bf16.msra.mxu0 %v681_v15 }
  0x46   : > { %v1134_v7 = vsel %vm272_vm0, %v774_v2, %v271_v6  ;;  %468 = vmatpush.bf16.msra.mxu1 %v689_v47 }
  0x48   : > { %366 = vmatpush.bf16.msra.mxu0 %v680_v16 }
  0x4a   : > { %469 = vmatpush.bf16.msra.mxu1 %v688_v48 }
  0x4c   : > { %367 = vmatpush.bf16.msra.mxu0 %v679_v17 }
  0x4e   : > { %470 = vmatpush.bf16.msra.mxu1 %v687_v49 }
  0x50   : > { %368 = vmatpush.bf16.msra.mxu0 %v678_v18 }
  0x52   : > { %471 = vmatpush.bf16.msra.mxu1 %v686_v50 }
  0x54   : > { %369 = vmatpush.bf16.msra.mxu0 %v677_v19 }
  0x56   : > { %472 = vmatpush.bf16.msra.mxu1 %v685_v51 }
  0xaa   : > { %v266_v8 = vpop.xlane.xlu0 %265 }
  0xab   : > { %v274_v9 = vmul.f32 %v1134_v7, %v266_v8 }
  0xad   : > { %v275_v10 = vsub.f32 %v1131_v0, %v274_v9 }
  0xaf   : > { %v276_v11 = vmul.f32 %v275_v10, %v275_v10 }
  0xb1   : > { %277 = vadd.xlane.f32.xlu0 %v276_v11 }
 0x124   : > { %v278_v20 = vpop.xlane.xlu0 %277 }
 0x125   : > { %v279_v21 = vmul.f32 %v278_v20, %v1134_v7 }
 0x127   : > { %v280_v22 = vadd.f32 1e-05, %v279_v21 }
 0x129   : > { %775 = vrsqrt.f32 %v280_v22  ;;  %vm287_vm2 = vweird.f32 %v280_v22 }
 0x12f   : > { %v776_v23 = vpop.eup %775 }
 0x130   : > { %v282_v24 = vmul.f32 %v776_v23, %v280_v22  ;;  %vm288_vm1 = vweird.f32 %v776_v23 }
 0x131   : > { %vm289_vm3 = vmor %vm287_vm2, %vm288_vm1 }
 0x132   : > { %v283_v25 = vmul.f32 %v776_v23, %v282_v24 }
 0x134   : > { %v284_v26 = vmul.f32 0.5, %v283_v25 }
 0x136   : > { %v285_v27 = vsub.f32 1.5, %v284_v26 }
 0x138   : > { %v286_v29 = vmul.f32 %v776_v23, %v285_v27 }
 0x13a   : > { %v290_v31 = vsel %vm289_vm3, %v776_v23, %v286_v29 }
 0x13b   : > { %v291_v32 = vmul.f32 %v290_v31, %v275_v10 }
 0x13d   : > { %v293_v34 = vmul.f32 %v292_v30, %v291_v32 }
 0x13f   : > { %v295_v35 = vadd.f32 %v294_v33, %v293_v34 }
 0x141   : > { %v296_v36 = vmax.f32 %v295_v35, 0.0 }
 0x143   : > { %v297_v37 = vpack.c.bf16 %v296_v36, %v296_v36 }
 0x145   : > { %370 = vmatmul.bf16.vlgmr.msra.gmra.mxu0 %v297_v37 }
 0x1c2   : > { %v371_v38 = vpop.f32.mrf.mxu0 }
 0x1c3   : > { %375 = vadd.xlane.f32.xlu1 %v371_v38 }
 0x1ca   : > { %v373_v39 = vpop.f32.mrf.mxu0 }
 0x236   : > { %v376_v40 = vpop.xlane.xlu1 %375 }
 0x237   : > { %v377_v41 = vmul.f32 %v376_v40, %v1134_v7 }
 0x239   : > { %v378_v42 = vsub.f32 %v371_v38, %v377_v41 }
 0x23b   : > { %v379_v43 = vmul.f32 %v378_v42, %v378_v42 }
 0x23d   : > { %380 = vadd.xlane.f32.xlu1 %v379_v43 }
 0x2b0   : > { %v381_v52 = vpop.xlane.xlu1 %380 }
 0x2b1   : > { %v382_v53 = vmul.f32 %v381_v52, %v1134_v7 }
 0x2b3   : > { %v383_v54 = vadd.f32 1e-05, %v382_v53 }
 0x2b5   : > { %777 = vrsqrt.f32 %v383_v54  ;;  %vm390_vm5 = vweird.f32 %v383_v54 }
 0x2bb   : > { %v778_v55 = vpop.eup %777 }
 0x2bc   : > { %v385_v56 = vmul.f32 %v778_v55, %v383_v54  ;;  %vm391_vm4 = vweird.f32 %v778_v55 }
 0x2bd   : > { %vm392_vm6 = vmor %vm390_vm5, %vm391_vm4 }
 0x2be   : > { %v386_v57 = vmul.f32 %v778_v55, %v385_v56 }
 0x2c0   : > { %v387_v58 = vmul.f32 0.5, %v386_v57 }
 0x2c2   : > { %v388_v59 = vsub.f32 1.5, %v387_v58 }
 0x2c4   : > { %v389_v60 = vmul.f32 %v778_v55, %v388_v59 }
 0x2c6   : > { %v393_v62 = vsel %vm392_vm6, %v778_v55, %v389_v60 }
 0x2c7   : > { %v394_v63 = vmul.f32 %v393_v62, %v378_v42 }
 0x2c9   : > { %v396_v2 = vmul.f32 %v395_v61, %v394_v63 }
 0x2cb   : > { %v398_v3 = vadd.f32 %v397_v1, %v396_v2 }
 0x2cd   : > { %v399_v4 = vmax.f32 %v398_v3, 0.0 }
 0x2cf   : > { %v400_v5 = vpack.c.bf16 %v399_v4, %v399_v4 }
 0x2d1   : > { %473 = vmatmul.bf16.vlgmr.msra.gmra.mxu1 %v400_v5 }
 0x34e   : > { %v474_v6 = vpop.f32.mrf.mxu1 }
 0x34f   : > { %v475_v7 = vadd.f32 %v474_v6, %v1131_v0 }
 0x351   : > { %v478_v8 = vmax.f32 %v475_v7, 0.0 }
 0x353   : > { %479 = vst [vmem:[%s262_s10] sm:$0xff] %v478_v8 }
 0x354   : > { %926 = shalt.err (!%p923_p9)
}
 0x355   : > { %707 = dma.vmem_to_hbm [thread:$0]  (%p1082_p13), %s494_s11, 128, %s496_s12, %s481_s13  }
 0x356   : > { %v476_v0 = vpop.f32.mrf.mxu1 }
 0x357 PF: > { %s507_s26 = sand.u32 1, %s961_s15   ;;  %p1188_p10 = scmp.ge.s32.totalorder %s973_s18, 2 }
 0x358   : > { %s508_s6 = scalar_lea.sflag [#allocation4], %s507_s26 }
 0x359   : > { %p724_p11 = pnand %p1188_p10, %p1087_p4 }
 0x35b   : > { %p725_p0 = pneg %p724_p11 }
 0x35d   : > { %956 = dma.done.wait (%p725_p0), %s508_s6, 128  }
 0x35e   : > { %958 = vsyncadd (%p725_p0), %s508_s6, 4294967168  ;;  %p19_p2 = scmp.ge.s32.totalorder %s1062_s14, 4   ;;  %s1189_s15 = smov %s965_s16 }
 0x35f   : > { %s1190_s16 = smov %s969_s17  ;;  %s1191_s17 = smov %s1074_s21 }
 0x360   : > { %s1192_s18 = smov %s1062_s14  ;;  %21 = sbr.rel (!%p19_p2) target bundleno = 7 (0x7), region = 93 }
 0x365   :  { %514 = vsyncpa [#allocation3], 1 }
 0x366   :  { %516 = vsyncpa [#allocation3 + $0x1], 1 }
 0x367   :  { %517 = vsyncpa [#allocation6], 1 }
 0x368   :  { %518 = vsyncpa [#allocation9], 1 }
 0x369   :  { %519 = vsyncpa [#allocation4], 1 }
 0x36a   :  { %521 = vsyncpa [#allocation4 + $0x1], 1 }

</bundles_post_ra>
